<compile_context>
chip_gen: v7x
topology: tpu7x:2x2x1
jax: 0.10.0
libtpu: 0.0.40
codegen_flags: <defaults>
</compile_context>

<pallas_src>
import math

import jax
import jax.numpy as jnp
from jax.experimental import pallas as pl
from jax.experimental.pallas import tpu as pltpu


_TARGET_CHUNK_BYTES = 4 * 1024 * 1024   # ~4 MiB per DMA chunk (descriptor-friendly)


# --------------------------------------------------------------------------
# Kernel builder: each grid program copies its chunk of leading-axis "units"
# (rows of a (rows, 128) view, or raw elements for ragged sizes) directly
# HBM -> HBM with two concurrent DMA descriptors.
# --------------------------------------------------------------------------
def _build_dma_copy_kernel(total_units, chunk_units, grid_len):
    last_units = total_units - (grid_len - 1) * chunk_units  # static tail size

    def kernel(x_hbm, o_hbm, sem):
        i = pl.program_id(0)
        start = i * chunk_units

        def issue(off, size, slot):
            cp = pltpu.make_async_copy(
                x_hbm.at[pl.ds(start + off, size)],
                o_hbm.at[pl.ds(start + off, size)],
                sem.at[slot],
            )
            cp.start()
            return cp

        def copy_block(size):
            half = size // 2
            if half > 0:
                # Two in-flight DMAs per program (double-buffered sem slots).
                c0 = issue(0, half, 0)
                c1 = issue(half, size - half, 1)
                c0.wait()
                c1.wait()
            else:
                issue(0, size, 0).wait()

        if last_units == chunk_units:
            # Even tiling: no ragged tail, no masked/partial blocks.
            copy_block(chunk_units)
        else:
            is_last = i == (grid_len - 1)

            @pl.when(jnp.logical_not(is_last))
            def _():
                copy_block(chunk_units)

            @pl.when(is_last)
            def _():
                copy_block(last_units)

    return kernel


def _pallas_identity_copy(flat):
    """Tiled direct HBM->HBM DMA identity copy of a 1-D array (demo path)."""
    n = flat.shape[0]
    if n == 0:
        return flat
    itemsize = jnp.dtype(flat.dtype).itemsize

    # Lane-dense (rows, 128) view when possible (metadata-only).  Any leading-
    # axis block of this view is one contiguous HBM span, so each DMA is a
    # single linear copy.  Ragged totals use the raw 1-D view instead of
    # silently degrading to the metadata path.
    if n % 128 == 0:
        arr = flat.reshape(n // 128, 128)
        unit_bytes = 128 * itemsize
    else:
        arr = flat
        unit_bytes = itemsize
    total_units = arr.shape[0]

    # ~4 MiB per chunk, but cap so the grid has >= 2 programs whenever the
    # tensor is non-trivial, so v7x megacore sharding actually splits the copy.
    target_units = max(1, _TARGET_CHUNK_BYTES // unit_bytes)
    chunk_units = min(target_units, total_units)
    if total_units >= 2:
        chunk_units = min(chunk_units, (total_units + 1) // 2)
    chunk_units = max(1, chunk_units)
    grid_len = int(pl.cdiv(total_units, chunk_units))

    kernel = _build_dma_copy_kernel(total_units, chunk_units, grid_len)

    # NOTE: input_output_aliases={0: 0} would make this a self-copy over the
    # same HBM buffer (overlapping DMA src/dst), so it is intentionally omitted.
    out = pl.pallas_call(
        kernel,
        out_shape=jax.ShapeDtypeStruct(arr.shape, arr.dtype),
        grid=(grid_len,),
        in_specs=[pl.BlockSpec(memory_space=pl.ANY)],
        out_specs=pl.BlockSpec(memory_space=pl.ANY),
        scratch_shapes=[pltpu.SemaphoreType.DMA((2,))],
        compiler_params=pltpu.CompilerParams(
            dimension_semantics=("parallel",),   # shard chunks across TCs (v7x)
        ),
        cost_estimate=pl.CostEstimate(
            flops=0, transcendentals=0, bytes_accessed=2 * n * itemsize),
    )(arr)
    return out.reshape(n)                        # metadata-only


def _resolve_target_shape(batch, feat, shape):
    """Resolve an optional -1 wildcard and validate element counts."""
    shape = tuple(int(s) for s in shape)
    if shape.count(-1) > 1:
        raise ValueError("Reshape: at most one -1 wildcard is allowed")
    if -1 in shape:
        known = math.prod(s for s in shape if s != -1)
        if known == 0 or feat % known != 0:
            raise ValueError("Reshape: cannot infer -1 dimension")
        shape = tuple(feat // known if s == -1 else s for s in shape)
    tgt = (batch,) + shape
    if math.prod(tgt) != batch * feat:
        raise ValueError("Reshape: element count mismatch")
    return tgt


def pallas_reshape(x, shape, *, use_pallas_copy=False):
    """Equivalent of torch.Tensor.view((x.size(0),) + shape)."""
    b = x.shape[0]
    f = math.prod(x.shape[1:]) if x.ndim > 1 else 1
    tgt = _resolve_target_shape(b, f, shape)

    if not use_pallas_copy:
        # Production path: .view() on contiguous memory is metadata-only, and
        # so is jnp.reshape on a row-major JAX array — no HBM traffic at all.
        return x.reshape(tgt)

    # Demo path: flatten -> direct HBM->HBM DMA identity copy -> target view.
    flat = _pallas_identity_copy(x.reshape(b * f))
    return flat.reshape(tgt)


class Reshape:
    """JAX/Pallas mirror of the PyTorch Reshape module."""

    def __init__(self, *args, use_pallas_copy=False):
        self.shape = args
        self.use_pallas_copy = use_pallas_copy

    def __call__(self, x):
        return pallas_reshape(x, self.shape, use_pallas_copy=self.use_pallas_copy)


if __name__ == "__main__":
    key = jax.random.PRNGKey(0)
    # NCHW input (2, 4, 16, 16) reshaped to (2, 4, 256), as the module implies.
    x = jax.random.normal(key, (2, 4, 16, 16), dtype=jnp.float32)
    ref = x.reshape((x.shape[0], 4, 256))

    # 1) Production path (metadata-only, the recommended default).
    y_fast = jax.block_until_ready(Reshape(4, 256)(x))

    # 2) Pallas HBM->HBM DMA copy path (kernel exercised once on TPU).
    y_pl = jax.block_until_ready(Reshape(4, 256, use_pallas_copy=True)(x))

    for y in (y_fast, y_pl):
        assert y.shape == (2, 4, 256), y.shape
        assert y.dtype == x.dtype
        assert bool(jnp.array_equal(y, ref))

    print("KERNEL_OK")
</pallas_src>

<mosaic_0001>
module attributes {stable_mosaic.version = 11 : i64} {
  func.func @kernel(%arg0: i32, %arg1: memref<16x128xf32, #tpu.memory_space<any>>, %arg2: memref<16x128xf32, #tpu.memory_space<any>>, %arg3: memref<2x!tpu.dma_semaphore, #tpu.memory_space<semaphore_mem>>) attributes {dimension_semantics = [#tpu.dimension_semantics<parallel>], iteration_bounds = array<i64: 2>, scalar_prefetch = 0 : i64, scratch_operands = 1 : i64, tpu.core_type = #tpu.core_type<tc>, window_params = [{}, {}]} {
    %c8_i32 = arith.constant 8 : i32
    %0 = arith.muli %arg0, %c8_i32 : i32
    %c0_i32 = arith.constant 0 : i32
    %1 = arith.addi %0, %c0_i32 : i32
    %c0_i32_0 = arith.constant 0 : i32
    %2 = arith.addi %0, %c0_i32_0 : i32
    %c0_i32_1 = arith.constant 0 : i32
    %c0_i32_2 = arith.constant 0 : i32
    %3 = tpu.memref_slice %arg1[%1, %c0_i32_2] : memref<16x128xf32, #tpu.memory_space<any>> -> memref<4x128xf32, #tpu.memory_space<any>>
    %c0_i32_3 = arith.constant 0 : i32
    %4 = tpu.memref_slice %arg2[%2, %c0_i32_3] : memref<16x128xf32, #tpu.memory_space<any>> -> memref<4x128xf32, #tpu.memory_space<any>>
    %5 = tpu.memref_slice %arg3[%c0_i32_1] : memref<2x!tpu.dma_semaphore, #tpu.memory_space<semaphore_mem>> -> memref<1x!tpu.dma_semaphore, #tpu.memory_space<semaphore_mem>>
    %6 = tpu.memref_squeeze %5 : memref<1x!tpu.dma_semaphore, #tpu.memory_space<semaphore_mem>> -> memref<!tpu.dma_semaphore, #tpu.memory_space<semaphore_mem>>
    tpu.enqueue_dma source(%3 : memref<4x128xf32, #tpu.memory_space<any>>) target(%4 : memref<4x128xf32, #tpu.memory_space<any>>) target_semaphore(%6 : memref<!tpu.dma_semaphore, #tpu.memory_space<semaphore_mem>>)
    %c4_i32 = arith.constant 4 : i32
    %7 = arith.addi %0, %c4_i32 : i32
    %c4_i32_4 = arith.constant 4 : i32
    %8 = arith.addi %0, %c4_i32_4 : i32
    %c1_i32 = arith.constant 1 : i32
    %c0_i32_5 = arith.constant 0 : i32
    %9 = tpu.memref_slice %arg1[%7, %c0_i32_5] : memref<16x128xf32, #tpu.memory_space<any>> -> memref<4x128xf32, #tpu.memory_space<any>>
    %c0_i32_6 = arith.constant 0 : i32
    %10 = tpu.memref_slice %arg2[%8, %c0_i32_6] : memref<16x128xf32, #tpu.memory_space<any>> -> memref<4x128xf32, #tpu.memory_space<any>>
    %11 = tpu.memref_slice %arg3[%c1_i32] : memref<2x!tpu.dma_semaphore, #tpu.memory_space<semaphore_mem>> -> memref<1x!tpu.dma_semaphore, #tpu.memory_space<semaphore_mem>>
    %12 = tpu.memref_squeeze %11 : memref<1x!tpu.dma_semaphore, #tpu.memory_space<semaphore_mem>> -> memref<!tpu.dma_semaphore, #tpu.memory_space<semaphore_mem>>
    tpu.enqueue_dma source(%9 : memref<4x128xf32, #tpu.memory_space<any>>) target(%10 : memref<4x128xf32, #tpu.memory_space<any>>) target_semaphore(%12 : memref<!tpu.dma_semaphore, #tpu.memory_space<semaphore_mem>>)
    %c0_i32_7 = arith.constant 0 : i32
    %c0_i32_8 = arith.constant 0 : i32
    %13 = tpu.memref_slice %arg1[%1, %c0_i32_8] : memref<16x128xf32, #tpu.memory_space<any>> -> memref<4x128xf32, #tpu.memory_space<any>>
    %c0_i32_9 = arith.constant 0 : i32
    %14 = tpu.memref_slice %arg2[%2, %c0_i32_9] : memref<16x128xf32, #tpu.memory_space<any>> -> memref<4x128xf32, #tpu.memory_space<any>>
    %15 = tpu.memref_slice %arg3[%c0_i32_7] : memref<2x!tpu.dma_semaphore, #tpu.memory_space<semaphore_mem>> -> memref<1x!tpu.dma_semaphore, #tpu.memory_space<semaphore_mem>>
    %16 = tpu.memref_squeeze %15 : memref<1x!tpu.dma_semaphore, #tpu.memory_space<semaphore_mem>> -> memref<!tpu.dma_semaphore, #tpu.memory_space<semaphore_mem>>
    tpu.wait_dma2 semaphore(%16 : memref<!tpu.dma_semaphore, #tpu.memory_space<semaphore_mem>>) src(%13 : memref<4x128xf32, #tpu.memory_space<any>>) dst(%14 : memref<4x128xf32, #tpu.memory_space<any>>)
    %c1_i32_10 = arith.constant 1 : i32
    %c0_i32_11 = arith.constant 0 : i32
    %17 = tpu.memref_slice %arg1[%7, %c0_i32_11] : memref<16x128xf32, #tpu.memory_space<any>> -> memref<4x128xf32, #tpu.memory_space<any>>
    %c0_i32_12 = arith.constant 0 : i32
    %18 = tpu.memref_slice %arg2[%8, %c0_i32_12] : memref<16x128xf32, #tpu.memory_space<any>> -> memref<4x128xf32, #tpu.memory_space<any>>
    %19 = tpu.memref_slice %arg3[%c1_i32_10] : memref<2x!tpu.dma_semaphore, #tpu.memory_space<semaphore_mem>> -> memref<1x!tpu.dma_semaphore, #tpu.memory_space<semaphore_mem>>
    %20 = tpu.memref_squeeze %19 : memref<1x!tpu.dma_semaphore, #tpu.memory_space<semaphore_mem>> -> memref<!tpu.dma_semaphore, #tpu.memory_space<semaphore_mem>>
    tpu.wait_dma2 semaphore(%20 : memref<!tpu.dma_semaphore, #tpu.memory_space<semaphore_mem>>) src(%17 : memref<4x128xf32, #tpu.memory_space<any>>) dst(%18 : memref<4x128xf32, #tpu.memory_space<any>>)
    return
  }
}

</mosaic_0001>

<bundles_post_ra>
// kernel: tpu_custom_call.1
= control target key start
LH: loop header
LB: loop body
LE: loop exit
PB: predicated region body
PF: predicated region fallthrough
CT: control target
= control target key end

     0   :  { %s119_s6 = smov 0   ;;  %s144_s0 = inlined_call_operand.hbm [shape: f32[16,128], index: 0, kind: input, shape index: {}]   ;;  %s145_s1 = inlined_call_operand.hbm [shape: f32[16,128], index: 1, kind: output, shape index: {}]  }
   0x1 LB: > { %s94_s7 = sshll.u32 %s121_s6, 7  ;;  %s123_s14 = smov [#allocation2]   ;;  %s121_s6 = sphi %s119_s6, %s11_s6  }
   0x2   : > { %s15_s10 = scalar_lea.hbm %s144_s0, %s94_s7  ;;  %s17_s13 = scalar_lea.hbm %s145_s1, %s94_s7 }
   0x3   : > { %s124_s15 = smov [#allocation3]   ;;  %s125_s16 = smov 0  }
   0x4   : > { %30 = dma.general %s15_s10, 64, %s17_s13, %s123_s14, %s124_s15, [#allocation4], %s125_s16, 0  }
   0x5   : > { %s75_s17 = scalar_lea.hbm %s15_s10, 64  ;;  %s79_s18 = scalar_lea.hbm %s17_s13, 64 }
   0x6   : > { %s126_s19 = smov [#allocation2 + $0x1]   ;;  %s127_s20 = smov [#allocation5]  }
   0x7   : > { %49 = dma.general %s75_s17, 64, %s79_s18, %s126_s19, %s127_s20, [#allocation6], %s125_s16, 0  }
   0x8   : > { %115 = dma.done.wait [#allocation2], 64 }
   0x9   : > { %116 = vsyncadd [#allocation2], 4294967232 }
   0xa   : > { %117 = dma.done.wait [#allocation2 + $0x1], 64 }
   0xb   : > { %118 = vsyncadd [#allocation2 + $0x1], 4294967232  ;;  %s11_s6 = sadd.s32 1, %s121_s6  }
   0xc   : > { %p8_p0 = scmp.ge.s32.totalorder %s11_s6, 2  }
   0xe   :  { %10 = sbr.rel (!%p8_p0) target bundleno = 1 (0x1), region = 25 }
  0x15   :  { %55 = vsyncmov [#allocation2] }
  0x18   :  { %s56_s21 = vpop.sfrf %55 }
  0x19   :  { %p92_p1 = scmp.ne.s32.totalorder %s56_s21, 0 }
  0x1b   :  { %60 = shalt.err (%p92_p1)  }
  0x1c   :  { %62 = vsyncmov [#allocation2 + $0x1] }
  0x1f   :  { %s63_s22 = vpop.sfrf %62 }
  0x20   :  { %p93_p2 = scmp.ne.s32.totalorder %s63_s22, 0 }
  0x22   :  { %67 = shalt.err (%p93_p2)  }

</bundles_post_ra>
